<compile_context>
chip_gen: v7x
topology: tpu7x:2x2x1
jax: 0.10.0
libtpu: 0.0.40
codegen_flags: <defaults>
</compile_context>

<pallas_src>
import math
import functools

import jax
import jax.numpy as jnp
from jax.experimental import pallas as pl
from jax.experimental.pallas import tpu as pltpu


def _build_pe(max_len: int, d_model: int) -> jnp.ndarray:
    """Deterministic sinusoidal table, identical math to the torch __init__."""
    position = jnp.arange(max_len, dtype=jnp.float32)[:, None]            # (L, 1)
    div_term = jnp.exp(
        jnp.arange(0, d_model, 2, dtype=jnp.float32)
        * (-math.log(10000.0) / d_model))                                  # (D/2,)
    ang = position * div_term                                              # (L, D/2)
    pe = jnp.zeros((max_len, d_model), jnp.float32)
    pe = pe.at[:, 0::2].set(jnp.sin(ang))
    pe = pe.at[:, 1::2].set(jnp.cos(ang))
    return pe[:, None, :]                                                  # (L, 1, D)


# ---- int32-only counter hash (bit-identical to murmur3 fmix32) -------------

def _lsr32(x, k: int):
    # Logical right shift for int32: arithmetic shift + mask off sign bits.
    return jnp.bitwise_and(jnp.right_shift(x, k), (1 << (32 - k)) - 1)


def _fmix32(x):
    x = x ^ _lsr32(x, 16)
    x = x * (-2048144789)          # 0x85EBCA6B as int32 (wrapping multiply)
    x = x ^ _lsr32(x, 13)
    x = x * (-1028477387)          # 0xC2B2AE35 as int32
    x = x ^ _lsr32(x, 16)
    return x


_GOLDEN = -1640531527              # 0x9E3779B9 as int32


def _pos_enc_kernel(seed_ref, x_ref, pe_ref, o_ref, *, p: float, training: bool):
    # x_ref: (sb, B, D), pe_ref: (sb, 1, D) -> broadcast add over batch.
    y = x_ref[...] + pe_ref[...]
    if training and p > 0.0:
        if p >= 1.0:
            y = jnp.zeros_like(y)
        else:
            # Inverted dropout.  Mask comes from a hash of the absolute element
            # index + seed, so it is independent of tiling and backend.
            # TODO(synk): cannot reproduce torch's Philox dropout stream
            # bit-exactly; the keep probability (1-p) and scaling match.
            sb, B, D = x_ref.shape
            row0 = pl.program_id(0) * sb
            r = jax.lax.broadcasted_iota(jnp.int32, (sb, B, D), 0) + row0
            b = jax.lax.broadcasted_iota(jnp.int32, (sb, B, D), 1)
            d = jax.lax.broadcasted_iota(jnp.int32, (sb, B, D), 2)
            idx = (r * B + b) * D + d                       # absolute flat index
            h = _fmix32(idx ^ (seed_ref[0] * _GOLDEN))
            r24 = _lsr32(h, 8)                              # uniform in [0, 2^24)
            thresh = min(max(int(round(p * (1 << 24))), 0), 1 << 24)
            keep = (r24 >= thresh).astype(y.dtype)
            y = y * (keep * (1.0 / (1.0 - p)))
    o_ref[...] = y.astype(o_ref.dtype)


def _ceil_div(a: int, b: int) -> int:
    return -(-a // b)


def _pick_seq_block(S: int, B: int, D: int, x_itemsize: int, pe_itemsize: int,
                    budget_bytes: int) -> int:
    # Double-buffered working set per step: 2 * (x_tile + out_tile + pe_tile).
    per_row = 2 * (2 * B * D * x_itemsize + D * pe_itemsize)
    max_rows = max(int(budget_bytes // per_row), 1)
    n_steps = _ceil_div(S, min(S, max_rows))
    return _ceil_div(S, n_steps)        # evenly balanced, <= max_rows


def positional_encoding(x, pe, *, p=0.1, training=False, seed=0, seq_block=None,
                        vmem_budget_bytes=24 * 1024 * 1024):
    """x: (S, B, D); pe: (max_len, 1, D).  Returns dropout(x + pe[:S]).

    Note: callers should vary `seed` across layers/steps; the dropout mask is a
    pure function of (seed, element position).
    """
    S, B, D = x.shape
    if S > pe.shape[0]:
        raise ValueError(f"seq_len {S} exceeds positional table max_len {pe.shape[0]}")
    if pe.shape[1] != 1 or pe.shape[2] != D:
        raise ValueError(f"pe shape {pe.shape} incompatible with x shape {x.shape}")

    if seq_block is None:
        sb = _pick_seq_block(S, B, D,
                             jnp.dtype(x.dtype).itemsize,
                             jnp.dtype(pe.dtype).itemsize,
                             vmem_budget_bytes)
    else:
        sb = int(seq_block)
    grid = (_ceil_div(S, sb),)

    seed_arr = jnp.asarray([seed], dtype=jnp.int32)
    kernel = functools.partial(_pos_enc_kernel, p=float(p), training=bool(training))

    # NOTE: pass input_output_aliases={1: 0} here if the caller donates x and
    # wants to halve peak HBM footprint; omitted by default for safety.
    return pl.pallas_call(
        kernel,
        out_shape=jax.ShapeDtypeStruct((S, B, D), x.dtype),
        grid_spec=pltpu.PrefetchScalarGridSpec(
            num_scalar_prefetch=1,                       # seed -> SMEM
            grid=grid,
            in_specs=[
                pl.BlockSpec((sb, B, D), lambda i, seed: (i, 0, 0)),   # x tile
                pl.BlockSpec((sb, 1, D), lambda i, seed: (i, 0, 0)),   # pe rows
            ],
            out_specs=pl.BlockSpec((sb, B, D), lambda i, seed: (i, 0, 0)),
        ),
        compiler_params=pltpu.CompilerParams(
            dimension_semantics=("parallel",),           # steps independent
            vmem_limit_bytes=48 * 1024 * 1024),
    )(seed_arr, x, pe)


if __name__ == "__main__":
    key = jax.random.PRNGKey(0)
    S, B, D = 8, 2, 32                      # seq_len, batch, d_model
    MAX_LEN = 5000
    x = jax.random.normal(key, (S, B, D), dtype=jnp.float32)
    pe = _build_pe(MAX_LEN, D)

    ref = x + jax.lax.dynamic_slice_in_dim(pe, 0, S, axis=0)

    # Eval-mode (dropout == identity): checkable against plain JAX.
    out_eval = jax.block_until_ready(
        positional_encoding(x, pe, p=0.1, training=False))
    assert out_eval.shape == (S, B, D) and out_eval.dtype == x.dtype
    assert jnp.allclose(out_eval, ref, atol=1e-6, rtol=1e-6), "eval-mode mismatch"

    # Training-mode: every output element is either dropped (0) or scaled by 1/(1-p).
    out_tr = jax.block_until_ready(
        positional_encoding(x, pe, p=0.1, training=True, seed=42))
    scaled = ref / (1.0 - 0.1)
    dropped = out_tr == 0.0
    ok = jnp.logical_or(dropped, jnp.isclose(out_tr, scaled, atol=1e-5, rtol=1e-5))
    assert bool(jnp.all(ok)), "training-mode dropout pattern mismatch"
    frac = float(jnp.mean(dropped.astype(jnp.float32)))
    assert 0.0 < frac < 0.5, f"implausible drop fraction {frac}"

    print("KERNEL_OK")
</pallas_src>

<mosaic_0001>
module attributes {stable_mosaic.version = 11 : i64} {
  func.func @_pos_enc_kernel(%arg0: i32, %arg1: memref<1xi32, #tpu.memory_space<smem>>, %arg2: memref<8x2x32xf32, #tpu.memory_space<vmem>>, %arg3: memref<8x1x32xf32, #tpu.memory_space<vmem>>, %arg4: memref<8x2x32xf32, #tpu.memory_space<vmem>>) attributes {dimension_semantics = [#tpu.dimension_semantics<parallel>], iteration_bounds = array<i64: 1>, scalar_prefetch = 1 : i64, scratch_operands = 0 : i64, tpu.core_type = #tpu.core_type<tc>, window_params = [{transform_indices = @transform_0, window_bounds = array<i64: 8, 2, 32>}, {transform_indices = @transform_1, window_bounds = array<i64: 8, 1, 32>}, {transform_indices = @transform_2, window_bounds = array<i64: 8, 2, 32>}]} {
    %c0 = arith.constant 0 : index
    %c0_0 = arith.constant 0 : index
    %c0_1 = arith.constant 0 : index
    %0 = vector.load %arg2[%c0, %c0_0, %c0_1] : memref<8x2x32xf32, #tpu.memory_space<vmem>>, vector<8x2x32xf32>
    %c0_2 = arith.constant 0 : index
    %c0_3 = arith.constant 0 : index
    %c0_4 = arith.constant 0 : index
    %1 = vector.load %arg3[%c0_2, %c0_3, %c0_4] : memref<8x1x32xf32, #tpu.memory_space<vmem>>, vector<8x1x32xf32>
    %2 = vector.broadcast %1 : vector<8x1x32xf32> to vector<8x2x32xf32>
    %3 = arith.addf %0, %2 : vector<8x2x32xf32>
    %c0_5 = arith.constant 0 : index
    %c0_6 = arith.constant 0 : index
    %c0_7 = arith.constant 0 : index
    %4 = vector.load %arg4[%c0_5, %c0_6, %c0_7] : memref<8x2x32xf32, #tpu.memory_space<vmem>>, vector<8x2x32xf32>
    tpu.vector_store %arg4[%c0_5, %c0_6, %c0_7], %3 {strides = array<i32>} : memref<8x2x32xf32, #tpu.memory_space<vmem>>, vector<8x2x32xf32>,
    return
  }
  func.func @transform_0(%arg0: i32, %arg1: memref<1xi32, #tpu.memory_space<smem>>) -> (i32, i32, i32) {
    %c0_i32 = arith.constant 0 : i32
    %c0_i32_0 = arith.constant 0 : i32
    %c0_i32_1 = arith.constant 0 : i32
    return %arg0, %c0_i32, %c0_i32_0 : i32, i32, i32
  }
  func.func @transform_1(%arg0: i32, %arg1: memref<1xi32, #tpu.memory_space<smem>>) -> (i32, i32, i32) {
    %c0_i32 = arith.constant 0 : i32
    %c0_i32_0 = arith.constant 0 : i32
    %c0_i32_1 = arith.constant 0 : i32
    return %arg0, %c0_i32, %c0_i32_0 : i32, i32, i32
  }
  func.func @transform_2(%arg0: i32, %arg1: memref<1xi32, #tpu.memory_space<smem>>) -> (i32, i32, i32) {
    %c0_i32 = arith.constant 0 : i32
    %c0_i32_0 = arith.constant 0 : i32
    %c0_i32_1 = arith.constant 0 : i32
    return %arg0, %c0_i32, %c0_i32_0 : i32, i32, i32
  }
}

</mosaic_0001>

<bundles_post_ra>
// kernel: tpu_custom_call.1
= control target key start
LH: loop header
LB: loop body
LE: loop exit
PB: predicated region body
PF: predicated region fallthrough
CT: control target
= control target key end

     0   :  { %vm86_vm0 = vcmask 254976   ;;  %s237_s0 = inlined_call_operand.<no memory space> [shape: s32[1], index: 0, kind: input, shape index: {}]   ;;  %s238_s1 = inlined_call_operand.vmem [shape: f32[8,2,32], index: 1, kind: input, shape index: {}]   ;;  %s239_s2 = inlined_call_operand.vmem [shape: f32[5000,1,32], index: 2, kind: input, shape index: {}]   ;;  %s240_s3 = inlined_call_operand.hbm [shape: f32[8,2,32], index: 3, kind: output, shape index: {}]  }
   0x1   :  { %v14_v0 = vld [vmem:[%s238_s1] sm:$0x3]  ;;  %v15_v3 = vld [vmem:[%s238_s1 + $0x2] sm:$0x3]  ;;  %v16_v5 = vld [vmem:[%s238_s1 + $0x4] sm:$0x3] }
   0x2   :  { %v111_v1 = vld [vmem:[%s239_s2] ss:$0 sm:$0xff]  ;;  %v112_v4 = vld [vmem:[%s239_s2 + $0x1] ss:$0 sm:$0xff]  ;;  %v113_v7 = vld [vmem:[%s239_s2 + $0x2] ss:$0 sm:$0xff] }
   0x3   :  { %v78_v2 = vadd.f32 %v111_v1, %v14_v0  ;;  %v79_v6 = vadd.f32 %v112_v4, %v15_v3  ;;  %v17_v8 = vld [vmem:[%s238_s1 + $0x6] sm:$0x3]  ;;  %v114_v9 = vld [vmem:[%s239_s2 + $0x3] ss:$0 sm:$0xff]  ;;  %v80_v10 = vadd.f32 %v113_v7, %v16_v5  ;;  %v18_v12 = vld [vmem:[%s238_s1 + $0x8] sm:$0x3] }
   0x4   :  { %v81_v11 = vadd.f32 %v114_v9, %v17_v8  ;;  %v115_v13 = vld [vmem:[%s239_s2 + $0x4] ss:$0 sm:$0xff]  ;;  %v19_v14 = vld [vmem:[%s238_s1 + $0xa] sm:$0x3]  ;;  %v116_v16 = vld [vmem:[%s239_s2 + $0x5] ss:$0 sm:$0xff] }
   0x5   :  { %87 = vst.msk [vmem:[#allocation4] sm:$0x3] %vm86_vm0, %v78_v2  ;;  %88 = vst.msk [vmem:[#allocation4 + $0x2] sm:$0x3] %vm86_vm0, %v79_v6  ;;  %v82_v15 = vadd.f32 %v115_v13, %v18_v12  ;;  %v20_v17 = vld [vmem:[%s238_s1 + $0xc] sm:$0x3]  ;;  %v83_v19 = vadd.f32 %v116_v16, %v19_v14 }
   0x6   :  { %v117_v18 = vld [vmem:[%s239_s2 + $0x6] ss:$0 sm:$0xff]  ;;  %89 = vst.msk [vmem:[#allocation4 + $0x4] sm:$0x3] %vm86_vm0, %v80_v10  ;;  %90 = vst.msk [vmem:[#allocation4 + $0x6] sm:$0x3] %vm86_vm0, %v81_v11 }
   0x7   :  { %v84_v20 = vadd.f32 %v117_v18, %v20_v17  ;;  %v21_v21 = vld [vmem:[%s238_s1 + $0xe] sm:$0x3]  ;;  %v118_v22 = vld [vmem:[%s239_s2 + $0x7] ss:$0 sm:$0xff] }
   0x8   :  { %9 = vsyncpa [#allocation5], 0  ;;  %91 = vst.msk [vmem:[#allocation4 + $0x8] sm:$0x3] %vm86_vm0, %v82_v15  ;;  %v85_v23 = vadd.f32 %v118_v22, %v21_v21  ;;  %s146_s0 = smov [#allocation4]  }
   0x9   :  { %s100_s16 = sshll.u32 %s146_s0, 4  ;;  %92 = vst.msk [vmem:[#allocation4 + $0xa] sm:$0x3] %vm86_vm0, %v83_v19  ;;  %93 = vst.msk [vmem:[#allocation4 + $0xc] sm:$0x3] %vm86_vm0, %v84_v20  ;;  %s101_s16 = int_to_ptr.vmem [resolvable:$true] %s100_s16 }
   0xa   :  { %94 = vst.msk [vmem:[#allocation4 + $0xe] sm:$0x3] %vm86_vm0, %v85_v23  ;;  %s122_s17 = scalar_lea.vmem %s101_s16, 256  ;;  %p127_p1 = scmp.lt.s32.totalorder %s101_s16, %s101_s16 }
   0xb   :  { %p123_p0 = scmp.ne.s32.totalorder %s101_s16, %s122_s17  ;;  %p128_p2 = scmp.lt.s32.totalorder %s122_s17, %s122_s17 }
   0xd   :  { %p129_p3 = por %p128_p2, %p127_p1 }
   0xf   :  { %p130_p4 = pnand %p129_p3, %p123_p0 }
  0x11   :  { %133 = shalt.err (!%p130_p4)
}
  0x12   :  { %s134_s18 = scalar_lea.hbm %s240_s3, 256 }
  0x13   :  { %p135_p5 = scmp.ne.s32.totalorder %s240_s3, %s134_s18  ;;  %p138_p6 = scmp.lt.u32.totalorder %s134_s18, %s240_s3 }
  0x15   :  { %p140_p7 = pnand %p138_p6, %p135_p5 }
  0x17   :  { %143 = shalt.err (!%p140_p7)
}
  0x18   :  { %s147_s23 = smov 32   ;;  %s148_s24 = smov 2  }
  0x19   :  { %106 = dma.vmem_to_hbm [thread:$0]  %s101_s16, 256, %s240_s3, [#allocation5], %s147_s23, %s147_s23, %s148_s24  }
  0x1a   :  { %144 = dma.done.wait [#allocation5], 256  }
  0x1b   :  { %145 = vsyncadd [#allocation5], 4294967040 }
  0x1c   :  { %110 = vsyncpa [#allocation5], 1 }

</bundles_post_ra>
